<compile_context>
chip_gen: v7x
topology: tpu7x:2x2x1
jax: 0.10.0
libtpu: 0.0.40
codegen_flags: <defaults>
</compile_context>

<pallas_src>
import jax
import jax.numpy as jnp
from jax import lax
from jax.experimental import pallas as pl
from jax.experimental.pallas import tpu as pltpu


def _round_up(x, m):
    return ((x + m - 1) // m) * m


def mpnn_kernel(src_ref, dst_ref,               # VMEM [tile_e, 1] int32
                atom_ref, e_ref, w_ref, b_ref,  # VMEM inputs
                out_ref,                        # VMEM output [N_pad, O_pad]
                ft_ref):                        # VMEM scratch accumulator [N_pad, D_pad]
    k = pl.program_id(0)
    tile_e = e_ref.shape[0]
    n_pad = atom_ref.shape[0]

    # Zero the node-feature accumulator on the first edge tile.
    @pl.when(k == 0)
    def _():
        ft_ref[...] = jnp.zeros_like(ft_ref)

    # Tile-local one-hot selectors built in VMEM (never materialized in HBM).
    node_ids = lax.broadcasted_iota(jnp.int32, (tile_e, n_pad), 1)
    onehot_src = (node_ids == src_ref[...]).astype(jnp.float32)   # [tile_e, N_pad]
    onehot_dst = (node_ids == dst_ref[...]).astype(jnp.float32)   # [tile_e, N_pad]

    # Gather source-node features on the MXU: [tile_e, N] @ [N, D] -> [tile_e, D]
    gathered = jnp.dot(onehot_src, atom_ref[...],
                       preferred_element_type=jnp.float32)
    # u_mul_e message (VPU elementwise). Padded edges have e == 0 -> zero msg.
    msgs = gathered * e_ref[...]
    # Scatter-sum on the MXU: contract over the edge axis.
    #   ft[n, d] += sum_e onehot_dst[e, n] * msgs[e, d]
    ft_ref[...] += lax.dot_general(
        onehot_dst, msgs,
        dimension_numbers=(((0,), (0,)), ((), ())),
        preferred_element_type=jnp.float32)

    # Final grid step: linear layer on the MXU (lane-dense [N_pad,128]@[128,128]).
    @pl.when(k == pl.num_programs(0) - 1)
    def _():
        out = jnp.dot(ft_ref[...], w_ref[...],
                      preferred_element_type=jnp.float32)
        out_ref[...] = out + b_ref[...]


def mpnn_layer(atom_type, e, src_idx, dst_idx, weight, bias, *, edge_tile=128):
    """atom_type: [N, D] f32, e: [E, D] f32, src_idx/dst_idx: [E] int32,
    weight: [O, D] (PyTorch nn.Linear layout), bias: [O]. Returns [N, O] f32."""
    N, D = atom_type.shape
    E = e.shape[0]
    O = weight.shape[0]

    N_pad = _round_up(N, 8)
    D_pad = _round_up(D, 128)
    O_pad = _round_up(O, 128)
    E_pad = _round_up(max(E, 1), edge_tile)
    num_edge_tiles = E_pad // edge_tile

    # Zero-pad to lane-dense shapes (padded lanes/rows contribute exactly zero).
    atom_p = jnp.zeros((N_pad, D_pad), jnp.float32).at[:N, :D].set(
        atom_type.astype(jnp.float32))
    e_p = jnp.zeros((E_pad, D_pad), jnp.float32).at[:E, :D].set(
        e.astype(jnp.float32))
    w_p = jnp.zeros((D_pad, O_pad), jnp.float32).at[:D, :O].set(
        weight.T.astype(jnp.float32))
    b_p = jnp.zeros((1, O_pad), jnp.float32).at[0, :O].set(
        bias.astype(jnp.float32))
    # Padded edges point at node 0 with zero edge features -> no contribution.
    src_p = jnp.zeros((E_pad, 1), jnp.int32).at[:E, 0].set(
        src_idx.astype(jnp.int32))
    dst_p = jnp.zeros((E_pad, 1), jnp.int32).at[:E, 0].set(
        dst_idx.astype(jnp.int32))

    cost = pl.CostEstimate(
        flops=(2 * E_pad * N_pad * D_pad          # one-hot gather matmul
               + E_pad * D_pad                    # u_mul_e
               + 2 * E_pad * N_pad * D_pad        # one-hot scatter matmul
               + 2 * N_pad * D_pad * O_pad        # linear
               + N_pad * O_pad),                  # bias
        transcendentals=0,
        bytes_accessed=4 * (atom_p.size + e_p.size + w_p.size + b_p.size
                            + N_pad * O_pad + src_p.size + dst_p.size),
    )

    out_pad = pl.pallas_call(
        mpnn_kernel,
        out_shape=jax.ShapeDtypeStruct((N_pad, O_pad), jnp.float32),
        grid_spec=pltpu.PrefetchScalarGridSpec(
            num_scalar_prefetch=0,
            grid=(num_edge_tiles,),
            in_specs=[
                pl.BlockSpec((edge_tile, 1), lambda k: (k, 0)),       # src idx (tiled)
                pl.BlockSpec((edge_tile, 1), lambda k: (k, 0)),       # dst idx (tiled)
                pl.BlockSpec((N_pad, D_pad), lambda k: (0, 0)),       # atom_type (resident)
                pl.BlockSpec((edge_tile, D_pad), lambda k: (k, 0)),   # e (tiled over edges)
                pl.BlockSpec((D_pad, O_pad), lambda k: (0, 0)),       # W^T (resident)
                pl.BlockSpec((1, O_pad), lambda k: (0, 0)),           # bias
            ],
            out_specs=pl.BlockSpec((N_pad, O_pad), lambda k: (0, 0)),
            scratch_shapes=[pltpu.VMEM((N_pad, D_pad), jnp.float32)],
        ),
        compiler_params=pltpu.CompilerParams(
            dimension_semantics=("arbitrary",),   # edge axis is a reduction
            vmem_limit_bytes=32 * 1024 * 1024,
        ),
        cost_estimate=cost,
    )(src_p, dst_p, atom_p, e_p, w_p, b_p)

    # TODO(synk): for very large batched graphs, add a "parallel" node-tile grid
    # axis (megacore on v7x) with dst-range gating per node tile; unnecessary at
    # ZINC molecular-graph sizes.
    return out_pad[:N, :O]


if __name__ == "__main__":
    key = jax.random.PRNGKey(0)
    k_atom, k_e, k_src, k_dst, k_w, k_b = jax.random.split(key, 6)

    # Small synthetic graph.
    N = 16          # nodes
    E = 48          # edges
    input_dim = 32  # node / edge feature dim
    output_dim = 32

    atom_type = jax.random.normal(k_atom, (N, input_dim), dtype=jnp.float32)
    e = jax.random.normal(k_e, (E, input_dim), dtype=jnp.float32)
    src_idx = jax.random.randint(k_src, (E,), 0, N, dtype=jnp.int32)
    dst_idx = jax.random.randint(k_dst, (E,), 0, N, dtype=jnp.int32)

    # Deterministic nn.Linear parameters (PyTorch layout: weight [O, D], bias [O]).
    bound = 1.0 / (input_dim ** 0.5)
    weight = jax.random.uniform(k_w, (output_dim, input_dim),
                                minval=-bound, maxval=bound, dtype=jnp.float32)
    bias = jax.random.uniform(k_b, (output_dim,),
                              minval=-bound, maxval=bound, dtype=jnp.float32)

    out = mpnn_layer(atom_type, e, src_idx, dst_idx, weight, bias)
    out = jax.block_until_ready(out)

    # Pure-JAX reference (scatter-sum via segment_sum).
    msgs = atom_type[src_idx] * e                                  # [E, D]
    ft_ref = jax.ops.segment_sum(msgs, dst_idx, num_segments=N)    # [N, D]
    ref = ft_ref @ weight.T + bias

    assert out.shape == (N, output_dim)
    assert jnp.allclose(out, ref, atol=1e-4, rtol=1e-4), "mismatch vs reference"
    print("KERNEL_OK")
</pallas_src>

<mosaic_0001>
module attributes {stable_mosaic.version = 11 : i64} {
  func.func @mpnn_kernel(%arg0: i32, %arg1: memref<128x1xi32, #tpu.memory_space<vmem>>, %arg2: memref<128x1xi32, #tpu.memory_space<vmem>>, %arg3: memref<16x128xf32, #tpu.memory_space<vmem>>, %arg4: memref<128x128xf32, #tpu.memory_space<vmem>>, %arg5: memref<128x128xf32, #tpu.memory_space<vmem>>, %arg6: memref<1x128xf32, #tpu.memory_space<vmem>>, %arg7: memref<16x128xf32, #tpu.memory_space<vmem>>, %arg8: memref<16x128xf32, #tpu.memory_space<vmem>>) attributes {dimension_semantics = [#tpu.dimension_semantics<arbitrary>], iteration_bounds = array<i64: 1>, scalar_prefetch = 0 : i64, scratch_operands = 1 : i64, tpu.core_type = #tpu.core_type<tc>, window_params = [{transform_indices = @transform_0, window_bounds = array<i64: 128, 1>}, {transform_indices = @transform_1, window_bounds = array<i64: 128, 1>}, {pipeline_mode = #tpu.pipeline_mode<synchronous>, transform_indices = @transform_2, window_bounds = array<i64: 16, 128>}, {transform_indices = @transform_3, window_bounds = array<i64: 128, 128>}, {pipeline_mode = #tpu.pipeline_mode<synchronous>, transform_indices = @transform_4, window_bounds = array<i64: 128, 128>}, {pipeline_mode = #tpu.pipeline_mode<synchronous>, transform_indices = @transform_5, window_bounds = array<i64: 1, 128>}, {pipeline_mode = #tpu.pipeline_mode<synchronous>, transform_indices = @transform_6, window_bounds = array<i64: 16, 128>}]} {
    %c0_i32 = arith.constant 0 : i32
    %0 = arith.cmpi eq, %arg0, %c0_i32 : i32
    %1 = arith.extui %0 : i1 to i32
    %c0_i32_0 = arith.constant 0 : i32
    %2 = arith.cmpi ne, %1, %c0_i32_0 : i32
    scf.if %2 {
      %cst_15 = arith.constant 0.000000e+00 : f32
      %25 = vector.broadcast %cst_15 : f32 to vector<16x128xf32>
      %c0_16 = arith.constant 0 : index
      %c0_17 = arith.constant 0 : index
      %26 = vector.load %arg8[%c0_16, %c0_17] : memref<16x128xf32, #tpu.memory_space<vmem>>, vector<16x128xf32>
      tpu.vector_store %arg8[%c0_16, %c0_17], %25 {strides = array<i32>} : memref<16x128xf32, #tpu.memory_space<vmem>>, vector<16x128xf32>,
    } else {
    }
    %3 = tpu.iota {dimensions = array<i32: 1>} : vector<128x16xi32>
    %c0 = arith.constant 0 : index
    %c0_1 = arith.constant 0 : index
    %4 = vector.load %arg1[%c0, %c0_1] : memref<128x1xi32, #tpu.memory_space<vmem>>, vector<128x1xi32>
    %5 = vector.broadcast %4 : vector<128x1xi32> to vector<128x16xi32>
    %6 = arith.cmpi eq, %3, %5 : vector<128x16xi32>
    %7 = arith.extui %6 : vector<128x16xi1> to vector<128x16xi32>
    %8 = arith.sitofp %7 : vector<128x16xi32> to vector<128x16xf32>
    %c0_2 = arith.constant 0 : index
    %c0_3 = arith.constant 0 : index
    %9 = vector.load %arg2[%c0_2, %c0_3] : memref<128x1xi32, #tpu.memory_space<vmem>>, vector<128x1xi32>
    %10 = vector.broadcast %9 : vector<128x1xi32> to vector<128x16xi32>
    %11 = arith.cmpi eq, %3, %10 : vector<128x16xi32>
    %12 = arith.extui %11 : vector<128x16xi1> to vector<128x16xi32>
    %13 = arith.sitofp %12 : vector<128x16xi32> to vector<128x16xf32>
    %c0_4 = arith.constant 0 : index
    %c0_5 = arith.constant 0 : index
    %14 = vector.load %arg3[%c0_4, %c0_5] : memref<16x128xf32, #tpu.memory_space<vmem>>, vector<16x128xf32>
    %cst = arith.constant dense<0.000000e+00> : vector<128x128xf32>
    %15 = tpu.matmul %8, %14, %cst {dimension_numbers = #tpu.dot_dimension_numbers<[1], [0], [0], [1], [0, 0, 1, 1], [], []>} : vector<128x16xf32>, vector<16x128xf32>, vector<128x128xf32> -> vector<128x128xf32>
    %c0_6 = arith.constant 0 : index
    %c0_7 = arith.constant 0 : index
    %16 = vector.load %arg4[%c0_6, %c0_7] : memref<128x128xf32, #tpu.memory_space<vmem>>, vector<128x128xf32>
    %17 = arith.mulf %15, %16 : vector<128x128xf32>
    %c0_8 = arith.constant 0 : index
    %c0_9 = arith.constant 0 : index
    %18 = vector.load %arg8[%c0_8, %c0_9] : memref<16x128xf32, #tpu.memory_space<vmem>>, vector<16x128xf32>
    %cst_10 = arith.constant dense<0.000000e+00> : vector<16x128xf32>
    %19 = tpu.matmul %13, %17, %cst_10 {dimension_numbers = #tpu.dot_dimension_numbers<[0], [0], [1], [1], [0, 1, 1, 1], [], []>} : vector<128x16xf32>, vector<128x128xf32>, vector<16x128xf32> -> vector<16x128xf32>
    %20 = arith.addf %18, %19 : vector<16x128xf32>
    %c0_11 = arith.constant 0 : index
    %c0_12 = arith.constant 0 : index
    %21 = vector.load %arg8[%c0_11, %c0_12] : memref<16x128xf32, #tpu.memory_space<vmem>>, vector<16x128xf32>
    tpu.vector_store %arg8[%c0_11, %c0_12], %20 {strides = array<i32>} : memref<16x128xf32, #tpu.memory_space<vmem>>, vector<16x128xf32>,
    %c0_i32_13 = arith.constant 0 : i32
    %22 = arith.cmpi eq, %arg0, %c0_i32_13 : i32
    %23 = arith.extui %22 : i1 to i32
    %c0_i32_14 = arith.constant 0 : i32
    %24 = arith.cmpi ne, %23, %c0_i32_14 : i32
    scf.if %24 {
      %c0_15 = arith.constant 0 : index
      %c0_16 = arith.constant 0 : index
      %25 = vector.load %arg8[%c0_15, %c0_16] : memref<16x128xf32, #tpu.memory_space<vmem>>, vector<16x128xf32>
      %c0_17 = arith.constant 0 : index
      %c0_18 = arith.constant 0 : index
      %26 = vector.load %arg5[%c0_17, %c0_18] : memref<128x128xf32, #tpu.memory_space<vmem>>, vector<128x128xf32>
      %cst_19 = arith.constant dense<0.000000e+00> : vector<16x128xf32>
      %27 = tpu.matmul %25, %26, %cst_19 {dimension_numbers = #tpu.dot_dimension_numbers<[1], [0], [0], [1], [0, 0, 1, 1], [], []>} : vector<16x128xf32>, vector<128x128xf32>, vector<16x128xf32> -> vector<16x128xf32>
      %c0_20 = arith.constant 0 : index
      %c0_21 = arith.constant 0 : index
      %28 = vector.load %arg6[%c0_20, %c0_21] : memref<1x128xf32, #tpu.memory_space<vmem>>, vector<1x128xf32>
      %29 = vector.broadcast %28 : vector<1x128xf32> to vector<16x128xf32>
      %30 = arith.addf %27, %29 : vector<16x128xf32>
      %c0_22 = arith.constant 0 : index
      %c0_23 = arith.constant 0 : index
      %31 = vector.load %arg7[%c0_22, %c0_23] : memref<16x128xf32, #tpu.memory_space<vmem>>, vector<16x128xf32>
      tpu.vector_store %arg7[%c0_22, %c0_23], %30 {strides = array<i32>} : memref<16x128xf32, #tpu.memory_space<vmem>>, vector<16x128xf32>,
    } else {
    }
    return
  }
  func.func @transform_0(%arg0: i32) -> (i32, i32) {
    %c0_i32 = arith.constant 0 : i32
    %c0_i32_0 = arith.constant 0 : i32
    return %arg0, %c0_i32 : i32, i32
  }
  func.func @transform_1(%arg0: i32) -> (i32, i32) {
    %c0_i32 = arith.constant 0 : i32
    %c0_i32_0 = arith.constant 0 : i32
    return %arg0, %c0_i32 : i32, i32
  }
  func.func @transform_2(%arg0: i32) -> (i32, i32) {
    %c0_i32 = arith.constant 0 : i32
    %c0_i32_0 = arith.constant 0 : i32
    %c0_i32_1 = arith.constant 0 : i32
    return %c0_i32, %c0_i32_0 : i32, i32
  }
  func.func @transform_3(%arg0: i32) -> (i32, i32) {
    %c0_i32 = arith.constant 0 : i32
    %c0_i32_0 = arith.constant 0 : i32
    return %arg0, %c0_i32 : i32, i32
  }
  func.func @transform_4(%arg0: i32) -> (i32, i32) {
    %c0_i32 = arith.constant 0 : i32
    %c0_i32_0 = arith.constant 0 : i32
    %c0_i32_1 = arith.constant 0 : i32
    return %c0_i32, %c0_i32_0 : i32, i32
  }
  func.func @transform_5(%arg0: i32) -> (i32, i32) {
    %c0_i32 = arith.constant 0 : i32
    %c0_i32_0 = arith.constant 0 : i32
    %c0_i32_1 = arith.constant 0 : i32
    return %c0_i32, %c0_i32_0 : i32, i32
  }
  func.func @transform_6(%arg0: i32) -> (i32, i32) {
    %c0_i32 = arith.constant 0 : i32
    %c0_i32_0 = arith.constant 0 : i32
    %c0_i32_1 = arith.constant 0 : i32
    return %c0_i32, %c0_i32_0 : i32, i32
  }
}

</mosaic_0001>

<bundles_post_ra>
// kernel: tpu_custom_call.1
= control target key start
LH: loop header
LB: loop body
LE: loop exit
PB: predicated region body
PF: predicated region fallthrough
CT: control target
= control target key end

     0   :  { %11 = vsyncpa [#allocation4], 0  ;;  %s1406_s0 = inlined_call_operand.vmem [shape: s32[128,1], index: 0, kind: input, shape index: {}]   ;;  %s1407_s1 = inlined_call_operand.vmem [shape: s32[128,1], index: 1, kind: input, shape index: {}]   ;;  %s1408_s2 = inlined_call_operand.hbm [shape: f32[16,128], index: 2, kind: input, shape index: {}]   ;;  %s1409_s3 = inlined_call_operand.vmem [shape: f32[128,128], index: 3, kind: input, shape index: {}]   ;;  %s1410_s4 = inlined_call_operand.vmem [shape: f32[128,128], index: 4, kind: input, shape index: {}]   ;;  %s1411_s5 = inlined_call_operand.vmem [shape: f32[1,128], index: 5, kind: input, shape index: {}]   ;;  %s1412_s6 = inlined_call_operand.hbm [shape: f32[16,128], index: 6, kind: output, shape index: {}]  }
   0x1   :  { %12 = vsyncpa [#allocation5], 0  ;;  %s1058_s21 = smov [#allocation3]   ;;  %s1010_s25 = scalar_lea.hbm %s1408_s2, 256 }
   0x2   :  { %s22_s22 = sshll.u32 %s1058_s21, 4  ;;  %p1011_p0 = scmp.ne.s32.totalorder %s1408_s2, %s1010_s25  ;;  %s23_s22 = int_to_ptr.vmem [resolvable:$true] %s22_s22 }
   0x3   :  { %p1014_p1 = scmp.lt.u32.totalorder %s1010_s25, %s1408_s2 }
   0x5   :  { %p1016_p2 = pnand %p1014_p1, %p1011_p0 }
   0x7   :  { %1019 = shalt.err (!%p1016_p2)
}
   0x8   :  { %s1020_s30 = scalar_lea.vmem %s23_s22, 256  ;;  %p1025_p4 = scmp.lt.s32.totalorder %s23_s22, %s23_s22 }
   0x9   :  { %p1021_p3 = scmp.ne.s32.totalorder %s23_s22, %s1020_s30  ;;  %p1026_p5 = scmp.lt.s32.totalorder %s1020_s30, %s1020_s30 }
   0xb   :  { %p1027_p6 = por %p1026_p5, %p1025_p4 }
   0xd   :  { %p1028_p7 = pnand %p1027_p6, %p1021_p3 }
   0xf   :  { %1031 = shalt.err (!%p1028_p7)
}
  0x10   :  { %s1059_s7 = smov 128   ;;  %s1060_s8 = smov 8  }
  0x11   :  { %28 = dma.hbm_to_vmem [thread:$0]  %s1408_s2, 256, %s23_s22, [#allocation4], %s1059_s7, %s1059_s7, %s1060_s8  }
  0x12   :  { %1054 = dma.done.wait [#allocation4], 256  }
  0x13   :  { %1055 = vsyncadd [#allocation4], 4294967040  ;;  %v1061_v0 = vmov 0   ;;  %v48_v1 = vld [vmem:[%s1406_s0 + $0x10] sm:$0xff]  ;;  %v46_v2 = vld [vmem:[%s1406_s0] sm:$0xff]  ;;  %v44_v36 = vlaneseq  ;;  %vm272_vm0 = vcmask 130048  }
  0x14   :  { %1009 = vset.pattern.permute.xlu1 %v1061_v0  ;;  %1008 = vset.pattern.permute.xlu0 %v1061_v0  ;;  %v49_v3 = vld [vmem:[%s1406_s0 + $0x18] sm:$0xff]  ;;  %v47_v4 = vld [vmem:[%s1406_s0 + $0x8] sm:$0xff]  ;;  %v50_v6 = vld [vmem:[%s1406_s0 + $0x20] sm:$0xff]  ;;  %v1062_v40 = vmov 0.0  }
  0x15   :  { %69 = vperm.xlu1 %1009, %v48_v1   ;;  %63 = vperm.xlu0 %1008, %v46_v2   ;;  %v51_v5 = vld [vmem:[%s1406_s0 + $0x28] sm:$0xff]  ;;  %v53_v7 = vld [vmem:[%s1406_s0 + $0x38] sm:$0xff]  ;;  %v52_v8 = vld [vmem:[%s1406_s0 + $0x30] sm:$0xff]  ;;  %v1210_v37 = vand.u32 127, %v44_v36 }
  0x16   :  { %v270_v9 = vld [vmem:[#allocation3] sm:$0xff]  ;;  %v271_v10 = vld [vmem:[#allocation3 + $0x8] sm:$0xff]  ;;  %v57_v14 = vld [vmem:[%s1406_s0 + $0x58] sm:$0xff] }
  0x17   :  { %v934_v11 = vpack.c.bf16 %v271_v10, %v270_v9  ;;  %v55_v12 = vld [vmem:[%s1406_s0 + $0x48] sm:$0xff]  ;;  %v54_v13 = vld [vmem:[%s1406_s0 + $0x40] sm:$0xff]  ;;  %v56_v15 = vld [vmem:[%s1406_s0 + $0x50] sm:$0xff] }
  0x18   :  { %v59_v16 = vld [vmem:[%s1406_s0 + $0x68] sm:$0xff]  ;;  %v58_v17 = vld [vmem:[%s1406_s0 + $0x60] sm:$0xff]  ;;  %v61_v18 = vld [vmem:[%s1406_s0 + $0x78] sm:$0xff] }
  0x19   :  { %72 = vperm.xlu1 %1009, %v49_v3   ;;  %66 = vperm.xlu0 %1008, %v47_v4   ;;  %v60_v19 = vld [vmem:[%s1406_s0 + $0x70] sm:$0xff]  ;;  %v159_v20 = vld [vmem:[%s1407_s1 + $0x8] sm:$0xff]  ;;  %v158_v21 = vld [vmem:[%s1407_s1] sm:$0xff] }
  0x1a   :  { %935 = vmatprep.subr.bf16.mxu0 %v934_v11  ;;  %v161_v22 = vld [vmem:[%s1407_s1 + $0x18] sm:$0xff]  ;;  %v160_v23 = vld [vmem:[%s1407_s1 + $0x10] sm:$0xff]  ;;  %v163_v24 = vld [vmem:[%s1407_s1 + $0x28] sm:$0xff] }
  0x1b   :  { %937 = vmatpush3.bf16.msra.mxu0 %v934_v11  ;;  %v162_v25 = vld [vmem:[%s1407_s1 + $0x20] sm:$0xff]  ;;  %v165_v26 = vld [vmem:[%s1407_s1 + $0x38] sm:$0xff]  ;;  %v164_v27 = vld [vmem:[%s1407_s1 + $0x30] sm:$0xff] }
  0x1c   :  { %v167_v28 = vld [vmem:[%s1407_s1 + $0x48] sm:$0xff]  ;;  %v166_v29 = vld [vmem:[%s1407_s1 + $0x40] sm:$0xff]  ;;  %v169_v30 = vld [vmem:[%s1407_s1 + $0x58] sm:$0xff] }
  0x1d   :  { %78 = vperm.xlu1 %1009, %v51_v5   ;;  %75 = vperm.xlu0 %1008, %v50_v6   ;;  %v168_v31 = vld [vmem:[%s1407_s1 + $0x50] sm:$0xff]  ;;  %v171_v32 = vld [vmem:[%s1407_s1 + $0x68] sm:$0xff]  ;;  %v170_v33 = vld [vmem:[%s1407_s1 + $0x60] sm:$0xff] }
  0x1e   :  { %v173_v34 = vld [vmem:[%s1407_s1 + $0x78] sm:$0xff]  ;;  %v172_v35 = vld [vmem:[%s1407_s1 + $0x70] sm:$0xff] }
  0x21   :  { %84 = vperm.xlu1 %1009, %v53_v7   ;;  %81 = vperm.xlu0 %1008, %v52_v8  }
  0x25   :  { %90 = vperm.xlu1 %1009, %v55_v12   ;;  %87 = vperm.xlu0 %1008, %v54_v13  }
  0x29   :  { %96 = vperm.xlu1 %1009, %v57_v14   ;;  %93 = vperm.xlu0 %1008, %v56_v15  }
  0x2d   :  { %102 = vperm.xlu1 %1009, %v59_v16   ;;  %99 = vperm.xlu0 %1008, %v58_v17  }
  0x31   :  { %108 = vperm.xlu1 %1009, %v61_v18   ;;  %105 = vperm.xlu0 %1008, %v60_v19  }
  0x35   :  { %178 = vperm.xlu1 %1009, %v159_v20   ;;  %175 = vperm.xlu0 %1008, %v158_v21  }
  0x39   :  { %184 = vperm.xlu1 %1009, %v161_v22   ;;  %181 = vperm.xlu0 %1008, %v160_v23  }
  0x3d   :  { %190 = vperm.xlu1 %1009, %v163_v24   ;;  %187 = vperm.xlu0 %1008, %v162_v25  }
  0x41   :  { %196 = vperm.xlu1 %1009, %v165_v26   ;;  %193 = vperm.xlu0 %1008, %v164_v27  }
  0x45   :  { %202 = vperm.xlu1 %1009, %v167_v28   ;;  %199 = vperm.xlu0 %1008, %v166_v29  }
  0x49   :  { %208 = vperm.xlu1 %1009, %v169_v30   ;;  %205 = vperm.xlu0 %1008, %v168_v31  }
  0x4d   :  { %214 = vperm.xlu1 %1009, %v171_v32   ;;  %211 = vperm.xlu0 %1008, %v170_v33  }
  0x51   :  { %220 = vperm.xlu1 %1009, %v173_v34   ;;  %217 = vperm.xlu0 %1008, %v172_v35  }
  0x94   :  { %v70_v38 = vpop.permute.xlu1 %69  ;;  %v64_v39 = vpop.permute.xlu0 %63 }
  0x95   :  { %vm110_vm1 = vcmp.eq.s32.totalorder %v1210_v37, %v64_v39  ;;  %vm112_vm2 = vcmp.eq.s32.totalorder %v1210_v37, %v70_v38 }
  0x96   :  { %v733_v41 = vsel %vm110_vm1, 1.0, %v1062_v40  ;;  %v735_v44 = vsel %vm112_vm2, 1.0, %v1062_v40 }
  0x97   :  { %840 = vmatprep.mubr.msk.f32.mxu0 %vm272_vm0, %v733_v41  ;;  %v616_v41 = vld [vmem:[%s1410_s4] sm:$0xff] }
  0x98   :  { %v73_v42 = vpop.permute.xlu1 %72  ;;  %v67_v43 = vpop.permute.xlu0 %66 }
  0x99   :  { %vm111_vm3 = vcmp.eq.s32.totalorder %v1210_v37, %v67_v43  ;;  %vm113_vm4 = vcmp.eq.s32.totalorder %v1210_v37, %v73_v42  ;;  %v619_v43 = vld [vmem:[%s1410_s4 + $0x18] sm:$0xff] }
  0x9a   :  { %v734_v45 = vsel %vm111_vm3, 1.0, %v1062_v40  ;;  %v736_v48 = vsel %vm113_vm4, 1.0, %v1062_v40 }
  0x9b   :  { %841 = vmatmul.mubr.msk.f32.vlgmr.msra.gmra.mrb[0].mxu0 %vm272_vm0, %v734_v45  ;;  %v620_v45 = vld [vmem:[%s1410_s4 + $0x20] sm:$0xff] }
  0x9c   :  { %v79_v46 = vpop.permute.xlu1 %78  ;;  %843 = vmatprep.mubr.msk.f32.mxu0 %vm272_vm0, %v735_v44  ;;  %v76_v47 = vpop.permute.xlu0 %75 }
  0x9d   :  { %vm114_vm5 = vcmp.eq.s32.totalorder %v1210_v37, %v76_v47  ;;  %vm115_vm6 = vcmp.eq.s32.totalorder %v1210_v37, %v79_v46  ;;  %v621_v46 = vld [vmem:[%s1410_s4 + $0x28] sm:$0xff] }
  0x9e   :  { %v737_v49 = vsel %vm114_vm5, 1.0, %v1062_v40  ;;  %v738_v52 = vsel %vm115_vm6, 1.0, %v1062_v40  ;;  %v978_v47 = vpack.c.bf16 %v621_v46, %v620_v45 }
  0x9f   :  { %844 = vmatmul.mubr.msk.f32.gmra.mrb[2].mxu0 %vm272_vm0, %v736_v48  ;;  %v622_v48 = vld [vmem:[%s1410_s4 + $0x30] sm:$0xff] }
  0xa0   :  { %v85_v50 = vpop.permute.xlu1 %84  ;;  %846 = vmatprep.mubr.msk.f32.mxu0 %vm272_vm0, %v737_v49  ;;  %v82_v51 = vpop.permute.xlu0 %81  ;;  %v623_v49 = vld [vmem:[%s1410_s4 + $0x38] sm:$0xff] }
  0xa1   :  { %vm116_vm7 = vcmp.eq.s32.totalorder %v1210_v37, %v82_v51  ;;  %vm117_vm8 = vcmp.eq.s32.totalorder %v1210_v37, %v85_v50  ;;  %v982_v50 = vpack.c.bf16 %v623_v49, %v622_v48  ;;  %v624_v51 = vld [vmem:[%s1410_s4 + $0x40] sm:$0xff]  ;;  %v481_v48 = vld [vmem:[%s1409_s3 + $0x78] sm:$0xff]  ;;  %v480_v49 = vld [vmem:[%s1409_s3 + $0x70] sm:$0xff] }
  0xa2   :  { %v739_v53 = vsel %vm116_vm7, 1.0, %v1062_v40  ;;  %v740_v56 = vsel %vm117_vm8, 1.0, %v1062_v40 }
  0xa3   :  { %847 = vmatmul.mubr.msk.f32.gmra.mrb[4].mxu0 %vm272_vm0, %v738_v52  ;;  %v625_v52 = vld [vmem:[%s1410_s4 + $0x48] sm:$0xff] }
  0xa4   :  { %v91_v54 = vpop.permute.xlu1 %90  ;;  %849 = vmatprep.mubr.msk.f32.mxu0 %vm272_vm0, %v739_v53  ;;  %v88_v55 = vpop.permute.xlu0 %87  ;;  %v986_v53 = vpack.c.bf16 %v625_v52, %v624_v51 }
  0xa5   :  { %vm118_vm9 = vcmp.eq.s32.totalorder %v1210_v37, %v88_v55  ;;  %vm119_vm10 = vcmp.eq.s32.totalorder %v1210_v37, %v91_v54  ;;  %v626_v54 = vld [vmem:[%s1410_s4 + $0x50] sm:$0xff]  ;;  %v627_v55 = vld [vmem:[%s1410_s4 + $0x58] sm:$0xff] }
  0xa6   :  { %v741_v57 = vsel %vm118_vm9, 1.0, %v1062_v40  ;;  %v742_v60 = vsel %vm119_vm10, 1.0, %v1062_v40 }
  0xa7   :  { %850 = vmatmul.mubr.msk.f32.gmra.mrb[6].mxu0 %vm272_vm0, %v740_v56  ;;  %v990_v56 = vpack.c.bf16 %v627_v55, %v626_v54 }
  0xa8   :  { %v97_v58 = vpop.permute.xlu1 %96  ;;  %852 = vmatprep.mubr.msk.f32.mxu0 %vm272_vm0, %v741_v57  ;;  %v94_v59 = vpop.permute.xlu0 %93  ;;  %v628_v57 = vld [vmem:[%s1410_s4 + $0x60] sm:$0xff] }
  0xa9   :  { %vm120_vm11 = vcmp.eq.s32.totalorder %v1210_v37, %v94_v59  ;;  %vm121_vm12 = vcmp.eq.s32.totalorder %v1210_v37, %v97_v58  ;;  %v629_v58 = vld [vmem:[%s1410_s4 + $0x68] sm:$0xff] }
  0xaa   :  { %v743_v61 = vsel %vm120_vm11, 1.0, %v1062_v40  ;;  %v744_v0 = vsel %vm121_vm12, 1.0, %v1062_v40  ;;  %v994_v59 = vpack.c.bf16 %v629_v58, %v628_v57 }
  0xab   :  { %853 = vmatmul.mubr.msk.f32.gmra.mrb[8].mxu0 %vm272_vm0, %v742_v60  ;;  %v630_v60 = vld [vmem:[%s1410_s4 + $0x70] sm:$0xff] }
  0xac   :  { %v103_v62 = vpop.permute.xlu1 %102  ;;  %855 = vmatprep.mubr.msk.f32.mxu0 %vm272_vm0, %v743_v61  ;;  %v100_v63 = vpop.permute.xlu0 %99  ;;  %v631_v61 = vld [vmem:[%s1410_s4 + $0x78] sm:$0xff] }
  0xad   :  { %vm122_vm13 = vcmp.eq.s32.totalorder %v1210_v37, %v100_v63  ;;  %vm123_vm14 = vcmp.eq.s32.totalorder %v1210_v37, %v103_v62  ;;  %v998_v62 = vpack.c.bf16 %v631_v61, %v630_v60 }
  0xae   :  { %v745_v1 = vsel %vm122_vm13, 1.0, %v1062_v40  ;;  %v746_v4 = vsel %vm123_vm14, 1.0, %v1062_v40 }
  0xaf   :  { %856 = vmatmul.mubr.msk.f32.gmra.mrb[10].mxu0 %vm272_vm0, %v744_v0  ;;  %v467_v0 = vld [vmem:[%s1409_s3 + $0x8] sm:$0xff] }
  0xb0   :  { %v109_v2 = vpop.permute.xlu1 %108  ;;  %858 = vmatprep.mubr.msk.f32.mxu0 %vm272_vm0, %v745_v1  ;;  %v106_v3 = vpop.permute.xlu0 %105  ;;  %v466_v1 = vld [vmem:[%s1409_s3] sm:$0xff] }
  0xb1   :  { %vm124_vm15 = vcmp.eq.s32.totalorder %v1210_v37, %v106_v3  ;;  %vm125_vm1 = vcmp.eq.s32.totalorder %v1210_v37, %v109_v2 }
  0xb2   :  { %v747_v5 = vsel %vm124_vm15, 1.0, %v1062_v40  ;;  %v748_v8 = vsel %vm125_vm1, 1.0, %v1062_v40 }
  0xb3   :  { %859 = vmatmul.mubr.msk.f32.gmra.mrb[12].mxu0 %vm272_vm0, %v746_v4 }
  0xb4   :  { %v179_v6 = vpop.permute.xlu1 %178  ;;  %861 = vmatprep.mubr.msk.f32.mxu0 %vm272_vm0, %v747_v5  ;;  %v176_v7 = vpop.permute.xlu0 %175 }
  0xb5   :  { %vm222_vm2 = vcmp.eq.s32.totalorder %v1210_v37, %v176_v7  ;;  %vm223_vm3 = vcmp.eq.s32.totalorder %v1210_v37, %v179_v6  ;;  %v469_v6 = vld [vmem:[%s1409_s3 + $0x18] sm:$0xff]  ;;  %v468_v7 = vld [vmem:[%s1409_s3 + $0x10] sm:$0xff] }
  0xb6   :  { %v749_v9 = vsel %vm222_vm2, 1.0, %v1062_v40  ;;  %v750_v12 = vsel %vm223_vm3, 1.0, %v1062_v40 }
  0xb7   :  { %862 = vmatmul.mubr.msk.f32.gmra.mrb[14].mxu0 %vm272_vm0, %v748_v8  ;;  %500 = vxpose.xlu0.b32.start [1/16] (narrow) %v749_v9, 16 }
  0xb8   :  { %v185_v10 = vpop.permute.xlu1 %184  ;;  %v182_v11 = vpop.permute.xlu0 %181 }
  0xb9   :  { %vm224_vm4 = vcmp.eq.s32.totalorder %v1210_v37, %v182_v11  ;;  %vm225_vm5 = vcmp.eq.s32.totalorder %v1210_v37, %v185_v10 }
  0xba   :  { %v751_v15 = vsel %vm224_vm4, 1.0, %v1062_v40  ;;  %v752_v18 = vsel %vm225_vm5, 1.0, %v1062_v40 }
  0xbb   :  { %501 = vxpose.xlu0.b32.cont [2/16] (narrow) %v750_v12, 16 }
  0xbc   :  { %v191_v13 = vpop.permute.xlu1 %190  ;;  %v188_v14 = vpop.permute.xlu0 %187 }
  0xbd   :  { %vm226_vm0 = vcmp.eq.s32.totalorder %v1210_v37, %v188_v14  ;;  %vm227_vm8 = vcmp.eq.s32.totalorder %v1210_v37, %v191_v13  ;;  %v471_v13 = vld [vmem:[%s1409_s3 + $0x28] sm:$0xff]  ;;  %v470_v14 = vld [vmem:[%s1409_s3 + $0x20] sm:$0xff] }
  0xbe   :  { %v753_v21 = vsel %vm226_vm0, 1.0, %v1062_v40  ;;  %v754_v26 = vsel %vm227_vm8, 1.0, %v1062_v40 }
  0xbf   :  { %502 = vxpose.xlu0.b32.cont [3/16] (narrow) %v751_v15, 16 }
  0xc0   :  { %v197_v16 = vpop.permute.xlu1 %196  ;;  %v194_v17 = vpop.permute.xlu0 %193 }
  0xc1   :  { %vm228_vm11 = vcmp.eq.s32.totalorder %v1210_v37, %v194_v17  ;;  %vm229_vm14 = vcmp.eq.s32.totalorder %v1210_v37, %v197_v16 }
  0xc2   :  { %v755_v31 = vsel %vm228_vm11, 1.0, %v1062_v40  ;;  %v756_v36 = vsel %vm229_vm14, 1.0, %v1062_v40 }
  0xc3   :  { %503 = vxpose.xlu0.b32.cont [4/16] (narrow) %v752_v18, 16 }
  0xc4   :  { %v203_v19 = vpop.permute.xlu1 %202  ;;  %v200_v20 = vpop.permute.xlu0 %199 }
  0xc5   :  { %vm231_vm6 = vcmp.eq.s32.totalorder %v1210_v37, %v203_v19  ;;  %vm230_vm7 = vcmp.eq.s32.totalorder %v1210_v37, %v200_v20  ;;  %v473_v20 = vld [vmem:[%s1409_s3 + $0x38] sm:$0xff] }
  0xc6   :  { %v758_v22 = vsel %vm231_vm6, 1.0, %v1062_v40  ;;  %v757_v23 = vsel %vm230_vm7, 1.0, %v1062_v40 }
  0xc7   :  { %504 = vxpose.xlu0.b32.cont [5/16] (narrow) %v753_v21, 16  ;;  %v472_v21 = vld [vmem:[%s1409_s3 + $0x30] sm:$0xff] }
  0xc8   :  { %v209_v24 = vpop.permute.xlu1 %208  ;;  %v206_v25 = vpop.permute.xlu0 %205 }
  0xc9   :  { %vm233_vm9 = vcmp.eq.s32.totalorder %v1210_v37, %v209_v24  ;;  %vm232_vm10 = vcmp.eq.s32.totalorder %v1210_v37, %v206_v25 }
  0xca   :  { %v760_v27 = vsel %vm233_vm9, 1.0, %v1062_v40  ;;  %v759_v28 = vsel %vm232_vm10, 1.0, %v1062_v40 }
  0xcb   :  { %505 = vxpose.xlu0.b32.cont [6/16] (narrow) %v754_v26, 16 }
  0xcc   :  { %v215_v29 = vpop.permute.xlu1 %214  ;;  %v212_v30 = vpop.permute.xlu0 %211 }
  0xcd   :  { %vm235_vm12 = vcmp.eq.s32.totalorder %v1210_v37, %v215_v29  ;;  %vm234_vm13 = vcmp.eq.s32.totalorder %v1210_v37, %v212_v30 }
  0xce   :  { %v762_v32 = vsel %vm235_vm12, 1.0, %v1062_v40  ;;  %v761_v33 = vsel %vm234_vm13, 1.0, %v1062_v40 }
  0xcf   :  { %506 = vxpose.xlu0.b32.cont [7/16] (narrow) %v755_v31, 16 }
  0xd0   :  { %v221_v34 = vpop.permute.xlu1 %220  ;;  %v218_v35 = vpop.permute.xlu0 %217 }
  0xd1   :  { %vm237_vm15 = vcmp.eq.s32.totalorder %v1210_v37, %v221_v34  ;;  %vm236_vm1 = vcmp.eq.s32.totalorder %v1210_v37, %v218_v35  ;;  %v617_v37 = vld [vmem:[%s1410_s4 + $0x8] sm:$0xff]  ;;  %v477_v34 = vld [vmem:[%s1409_s3 + $0x58] sm:$0xff]  ;;  %v476_v35 = vld [vmem:[%s1409_s3 + $0x50] sm:$0xff] }
  0xd2   :  { %v764_v38 = vsel %vm237_vm15, 1.0, %v1062_v40  ;;  %v763_v39 = vsel %vm236_vm1, 1.0, %v1062_v40  ;;  %v618_v40 = vld [vmem:[%s1410_s4 + $0x10] sm:$0xff]  ;;  %v970_v42 = vpack.c.bf16 %v617_v37, %v616_v41 }
  0xd3   :  { %507 = vxpose.xlu0.b32.cont [8/16] (narrow) %v756_v36, 16  ;;  %v974_v44 = vpack.c.bf16 %v619_v43, %v618_v40  ;;  %v479_v40 = vld [vmem:[%s1409_s3 + $0x68] sm:$0xff] }
  0xd4   :  { %971 = vmatprep.subr.bf16.mxu0 %v970_v42 }
  0xd5   :  { %973 = vmatpush3.bf16.msra.mxu0 %v970_v42  ;;  %v478_v42 = vld [vmem:[%s1409_s3 + $0x60] sm:$0xff] }
  0xd6   :  { %975 = vmatprep.subr.bf16.mxu0 %v974_v44 }
  0xd7   :  { %508 = vxpose.xlu0.b32.cont [9/16] (narrow) %v757_v23, 16 }
  0xd9   :  { %977 = vmatpush3.bf16.msra.mxu0 %v974_v44 }
  0xda   :  { %979 = vmatprep.subr.bf16.mxu0 %v978_v47 }
  0xdb   :  { %509 = vxpose.xlu0.b32.cont [10/16] (narrow) %v758_v22, 16 }
  0xdd   :  { %981 = vmatpush3.bf16.msra.mxu0 %v978_v47 }
  0xde   :  { %983 = vmatprep.subr.bf16.mxu0 %v982_v50 }
  0xdf   :  { %510 = vxpose.xlu0.b32.cont [11/16] (narrow) %v759_v28, 16  ;;  %v474_v28 = vld [vmem:[%s1409_s3 + $0x40] sm:$0xff] }
  0xe1   :  { %985 = vmatpush3.bf16.msra.mxu0 %v982_v50 }
  0xe2   :  { %987 = vmatprep.subr.bf16.mxu0 %v986_v53 }
  0xe3   :  { %511 = vxpose.xlu0.b32.cont [12/16] (narrow) %v760_v27, 16  ;;  %v475_v27 = vld [vmem:[%s1409_s3 + $0x48] sm:$0xff]  ;;  %s1063_s3 = smov [#allocation6]  }
  0xe4   :  { %s721_s2 = sshll.u32 %s1063_s3, 4  ;;  %s722_s2 = int_to_ptr.vmem [resolvable:$true] %s721_s2 }
  0xe5   :  { %989 = vmatpush3.bf16.msra.mxu0 %v986_v53  ;;  %s1032_s17 = scalar_lea.vmem %s722_s2, 256  ;;  %p1037_p9 = scmp.lt.s32.totalorder %s722_s2, %s722_s2 }
  0xe6   :  { %991 = vmatprep.subr.bf16.mxu0 %v990_v56  ;;  %p1033_p8 = scmp.ne.s32.totalorder %s722_s2, %s1032_s17  ;;  %p1038_p10 = scmp.lt.s32.totalorder %s1032_s17, %s1032_s17 }
  0xe7   :  { %512 = vxpose.xlu0.b32.cont [13/16] (narrow) %v761_v33, 16 }
  0xe8   :  { %p1039_p11 = por %p1038_p10, %p1037_p9 }
  0xe9   :  { %993 = vmatpush3.bf16.msra.mxu0 %v990_v56 }
  0xea   :  { %995 = vmatprep.subr.bf16.mxu0 %v994_v59  ;;  %p1040_p12 = pnand %p1039_p11, %p1033_p8 }
  0xeb   :  { %513 = vxpose.xlu0.b32.cont [14/16] (narrow) %v762_v32, 16 }
  0xed   :  { %997 = vmatpush3.bf16.msra.mxu0 %v994_v59  ;;  %v781_v59 = vld [vmem:[%s1411_s5] ss:$0 sm:$0xff] }
  0xee   :  { %999 = vmatprep.subr.bf16.mxu0 %v998_v62 }
  0xef   :  { %514 = vxpose.xlu0.b32.cont [15/16] (narrow) %v763_v39, 16 }
  0xf1   :  { %1001 = vmatpush3.bf16.msra.mxu0 %v998_v62 }
  0xf3   :  { %515 = vxpose.xlu0.b32.end [16/16] (narrow) %v764_v38, 16 }
 0x137   :  { %v516_v63 = vpop.trf.xlu0 }
 0x138   :  { %896 = vmatprep.mubr.f32.mxu1 %v516_v63 }
 0x13b   :  { %v517_v56 = vpop.trf.xlu0 }
 0x16e   :  { %v842_v2 = vpop.f32.mrb[0].mxu0 }
 0x16f   :  { %v483_v3 = vmul.f32 %v842_v2, %v467_v0  ;;  %v387_v4 = vpop.f32.mrb[1].mxu0 }
 0x170   :  { %v482_v5 = vmul.f32 %v466_v1, %v387_v4 }
 0x172   :  { %v845_v8 = vpop.f32.mrb[2].mxu0  ;;  %v938_v9 = vpack.c.bf16 %v483_v3, %v482_v5 }
 0x173   :  { %v485_v10 = vmul.f32 %v845_v8, %v469_v6  ;;  %v397_v11 = vpop.f32.mrb[3].mxu0 }
 0x174   :  { %v484_v12 = vmul.f32 %v468_v7, %v397_v11  ;;  %939 = vmatprep.subr.bf16.mxu1 %v938_v9 }
 0x175   :  { %941 = vmatpush3.bf16.msra.mxu1 %v938_v9 }
 0x176   :  { %v942_v15 = vpack.c.bf16 %v485_v10, %v484_v12  ;;  %v848_v16 = vpop.f32.mrb[4].mxu0 }
 0x177   :  { %v487_v17 = vmul.f32 %v848_v16, %v471_v13  ;;  %v407_v18 = vpop.f32.mrb[5].mxu0 }
 0x178   :  { %v486_v19 = vmul.f32 %v470_v14, %v407_v18  ;;  %943 = vmatprep.subr.bf16.mxu1 %v942_v15 }
 0x179   :  { %945 = vmatpush3.bf16.msra.mxu1 %v942_v15 }
 0x17a   :  { %v946_v22 = vpack.c.bf16 %v487_v17, %v486_v19  ;;  %v851_v23 = vpop.f32.mrb[6].mxu0 }
 0x17b   :  { %v489_v24 = vmul.f32 %v851_v23, %v473_v20  ;;  %v417_v25 = vpop.f32.mrb[7].mxu0 }
 0x17c   :  { %v488_v26 = vmul.f32 %v472_v21, %v417_v25  ;;  %947 = vmatprep.subr.bf16.mxu1 %v946_v22 }
 0x17d   :  { %949 = vmatpush3.bf16.msra.mxu1 %v946_v22 }
 0x17e   :  { %v950_v29 = vpack.c.bf16 %v489_v24, %v488_v26  ;;  %v854_v30 = vpop.f32.mrb[8].mxu0 }
 0x17f   :  { %v491_v31 = vmul.f32 %v854_v30, %v475_v27  ;;  %v427_v32 = vpop.f32.mrb[9].mxu0 }
 0x180   :  { %v490_v33 = vmul.f32 %v474_v28, %v427_v32  ;;  %951 = vmatprep.subr.bf16.mxu1 %v950_v29 }
 0x181   :  { %953 = vmatpush3.bf16.msra.mxu1 %v950_v29 }
 0x182   :  { %v954_v36 = vpack.c.bf16 %v491_v31, %v490_v33  ;;  %v857_v38 = vpop.f32.mrb[10].mxu0 }
 0x183   :  { %v493_v39 = vmul.f32 %v857_v38, %v477_v34  ;;  %v437_v41 = vpop.f32.mrb[11].mxu0 }
 0x184   :  { %v492_v37 = vmul.f32 %v476_v35, %v437_v41  ;;  %955 = vmatprep.subr.bf16.mxu1 %v954_v36 }
 0x185   :  { %957 = vmatpush3.bf16.msra.mxu1 %v954_v36 }
 0x186   :  { %v958_v43 = vpack.c.bf16 %v493_v39, %v492_v37  ;;  %v860_v44 = vpop.f32.mrb[12].mxu0 }
 0x187   :  { %v495_v45 = vmul.f32 %v860_v44, %v479_v40  ;;  %v447_v46 = vpop.f32.mrb[13].mxu0 }
 0x188   :  { %v494_v47 = vmul.f32 %v478_v42, %v447_v46  ;;  %959 = vmatprep.subr.bf16.mxu1 %v958_v43 }
 0x189   :  { %961 = vmatpush3.bf16.msra.mxu1 %v958_v43 }
 0x18a   :  { %v962_v50 = vpack.c.bf16 %v495_v45, %v494_v47  ;;  %v863_v51 = vpop.f32.mrb[14].mxu0 }
 0x18b   :  { %v497_v52 = vmul.f32 %v863_v51, %v481_v48  ;;  %v457_v53 = vpop.f32.mrb[15].mxu0 }
 0x18c   :  { %v496_v54 = vmul.f32 %v480_v49, %v457_v53  ;;  %963 = vmatprep.subr.bf16.mxu1 %v962_v50 }
 0x18d   :  { %965 = vmatpush3.bf16.msra.mxu1 %v962_v50 }
 0x18e   :  { %v966_v55 = vpack.c.bf16 %v497_v52, %v496_v54 }
 0x190   :  { %967 = vmatprep.subr.bf16.mxu1 %v966_v55 }
 0x191   :  { %969 = vmatpush3.bf16.msra.mxu1 %v966_v55 }
 0x194   :  { %897 = vmatmul.mubr.f32.vlgmr.msra.gmra.mrb[0].mxu1 %v517_v56 }
 0x267   :  { %v898_v57 = vpop.f32.mrb[0].mxu1 }
 0x268   :  { %v598_v58 = vpop.f32.mrb[1].mxu1 }
 0x269   :  { %931 = vmatprep.mubr.f32.mxu0 %v598_v58 }
 0x26a   :  { %932 = vmatmul.mubr.f32.vlgmr.msra.gmra.mrb[16].mxu0 %v898_v57 }
 0x33d   :  { %v933_v60 = vpop.f32.mrb[16].mxu0 }
 0x33e   :  { %v711_v61 = vadd.f32 %v933_v60, %v781_v59  ;;  %v705_v62 = vpop.f32.mrb[17].mxu0 }
 0x33f   :  { %v706_v63 = vadd.f32 %v781_v59, %v705_v62 }
 0x340   :  { %715 = vst [vmem:[#allocation6 + $0x8] sm:$0xff] %v711_v61 }
 0x341   :  { %714 = vst [vmem:[#allocation6] sm:$0xff] %v706_v63 }
 0x342   :  { %1043 = shalt.err (!%p1040_p12)
}
 0x343   :  { %s1044_s5 = scalar_lea.hbm %s1412_s6, 256 }
 0x344   :  { %p1045_p13 = scmp.ne.s32.totalorder %s1412_s6, %s1044_s5  ;;  %p1048_p0 = scmp.lt.u32.totalorder %s1044_s5, %s1412_s6 }
 0x346   :  { %p1050_p1 = pnand %p1048_p0, %p1045_p13 }
 0x348   :  { %1053 = shalt.err (!%p1050_p1)
}
 0x349   :  { %727 = dma.vmem_to_hbm [thread:$0]  %s722_s2, 256, %s1412_s6, [#allocation5], %s1059_s7, %s1059_s7, %s1060_s8  }
 0x34a   :  { %1056 = dma.done.wait [#allocation5], 256  }
 0x34b   :  { %1057 = vsyncadd [#allocation5], 4294967040 }
 0x34c   :  { %731 = vsyncpa [#allocation4], 1 }
 0x34d   :  { %732 = vsyncpa [#allocation5], 1 }

</bundles_post_ra>
